<compile_context>
chip_gen: v5e
topology: v5e:2x2
jax: 0.10.0
libtpu: 0.0.40
codegen_flags: <defaults>
</compile_context>

<pallas_src>
import jax
import jax.numpy as jnp
from jax import lax
from jax.experimental import pallas as pl
from jax.experimental.pallas import tpu as pltpu


def _round_up(x, m):
    return (x + m - 1) // m * m


def target_entity_head_kernel(
    emb_ref,             # VMEM (TB, IN_PAD)  f32
    mask_ref,            # VMEM (TB, T_PAD)   i8   (1 = valid, 0 = masked / pad)
    noise_ref,           # VMEM (TB, T_PAD)   f32  (Gumbel(0,1) noise)
    w1_ref, b1_ref,      # (IN_PAD, D) bf16, (1, D) f32
    w2_ref, b2_ref,      # (D, D) bf16,      (1, D) f32
    w3_ref, b3_ref,      # (D, T_PAD) bf16,  (1, T_PAD) f32
    we1_ref, be1_ref,    # (T_PAD, M) bf16,  (1, M) f32
    we2_ref, be2_ref,    # (M, IN_PAD) bf16, (1, IN_PAD) f32
    logits_ref,          # out (TB, T_PAD)  f32
    idx_ref,             # out (TB, 128)    i32  (index broadcast across lanes)
    newemb_ref,          # out (TB, IN_PAD) f32
):
    emb = emb_ref[...]

    # fc1 -> relu -> fc2 -> relu -> fc3 (bf16 MXU, f32 accumulation, f32 elementwise)
    h = jnp.dot(emb.astype(jnp.bfloat16), w1_ref[...],
                preferred_element_type=jnp.float32) + b1_ref[...]
    h = jnp.maximum(h, 0.0)
    h = jnp.dot(h.astype(jnp.bfloat16), w2_ref[...],
                preferred_element_type=jnp.float32) + b2_ref[...]
    h = jnp.maximum(h, 0.0)
    x = jnp.dot(h.astype(jnp.bfloat16), w3_ref[...],
                preferred_element_type=jnp.float32) + b3_ref[...]

    # masked_fill(~mask, -1e9); padded lanes have mask == 0 so they can never win.
    x = jnp.where(mask_ref[...] != 0, x, -1.0e9)
    logits_ref[...] = x

    # multinomial(softmax(x), 1) == argmax(x + Gumbel noise)
    z = x + noise_ref[...]
    TB, T_PAD = z.shape
    col = lax.broadcasted_iota(jnp.int32, (TB, T_PAD), 1)
    zmax = jnp.max(z, axis=-1, keepdims=True)
    idx = jnp.min(jnp.where(z == zmax, col, T_PAD), axis=-1, keepdims=True)  # (TB, 1)
    idx_ref[...] = jnp.broadcast_to(idx, idx_ref.shape)  # lane-dense int32 slab

    # one_hot(targetentity, T) -> embed_fc1 (relu) -> embed_fc2, add residual.
    onehot = (col == idx).astype(jnp.bfloat16)  # exact 0/1 in bf16
    e = jnp.dot(onehot, we1_ref[...],
                preferred_element_type=jnp.float32) + be1_ref[...]
    e = jnp.maximum(e, 0.0)
    e = jnp.dot(e.astype(jnp.bfloat16), we2_ref[...],
                preferred_element_type=jnp.float32) + be2_ref[...]
    newemb_ref[...] = emb + e


@jax.jit
def target_entity_head(params, embedding, additional_feature, mask, key):
    # additional_feature is accepted but unused, matching the PyTorch forward.
    del additional_feature
    B, IN = embedding.shape
    T = mask.shape[1]
    D = params["w1"].shape[1]
    M = params["we1"].shape[1]

    # Lane-dense padding and batch tiling.
    IN_PAD = _round_up(IN, 128)
    T_PAD = _round_up(T, 128)
    TB = min(_round_up(B, 8), 128)
    B_PAD = _round_up(B, TB)
    grid = (B_PAD // TB,)

    # Per-batch tensors (padded, f32/int8); padded mask columns/rows are 0.
    emb_p = jnp.pad(embedding.astype(jnp.float32),
                    ((0, B_PAD - B), (0, IN_PAD - IN)))
    mask_p = jnp.pad(mask.astype(jnp.int8),
                     ((0, B_PAD - B), (0, T_PAD - T)))
    noise = jax.random.gumbel(key, (B_PAD, T_PAD), jnp.float32)

    # Weights in bf16 (halves weight DMA / VMEM), biases in f32, zero-padded so
    # the padded lanes contribute nothing.
    w1 = jnp.pad(params["w1"], ((0, IN_PAD - IN), (0, 0))).astype(jnp.bfloat16)
    b1 = params["b1"].astype(jnp.float32)
    w2 = params["w2"].astype(jnp.bfloat16)
    b2 = params["b2"].astype(jnp.float32)
    w3 = jnp.pad(params["w3"], ((0, 0), (0, T_PAD - T))).astype(jnp.bfloat16)
    b3 = jnp.pad(params["b3"], ((0, 0), (0, T_PAD - T))).astype(jnp.float32)
    we1 = jnp.pad(params["we1"], ((0, T_PAD - T), (0, 0))).astype(jnp.bfloat16)
    be1 = params["be1"].astype(jnp.float32)
    we2 = jnp.pad(params["we2"], ((0, 0), (0, IN_PAD - IN))).astype(jnp.bfloat16)
    be2 = jnp.pad(params["be2"], ((0, 0), (0, IN_PAD - IN))).astype(jnp.float32)

    def batch_spec(feat):
        return pl.BlockSpec((TB, feat), lambda i: (i, 0))

    def whole_spec(arr):
        return pl.BlockSpec(arr.shape, lambda i: (0, 0))

    in_specs = [
        batch_spec(IN_PAD),          # embedding
        batch_spec(T_PAD),           # mask
        batch_spec(T_PAD),           # gumbel noise
        whole_spec(w1), whole_spec(b1),
        whole_spec(w2), whole_spec(b2),
        whole_spec(w3), whole_spec(b3),
        whole_spec(we1), whole_spec(be1),
        whole_spec(we2), whole_spec(be2),
    ]
    out_specs = (
        batch_spec(T_PAD),           # logits
        batch_spec(128),             # sampled index (lane-dense slab)
        batch_spec(IN_PAD),          # new embedding
    )
    out_shape = (
        jax.ShapeDtypeStruct((B_PAD, T_PAD), jnp.float32),
        jax.ShapeDtypeStruct((B_PAD, 128), jnp.int32),
        jax.ShapeDtypeStruct((B_PAD, IN_PAD), jnp.float32),
    )

    matmul_terms = IN_PAD * D + D * D + D * T_PAD + T_PAD * M + M * IN_PAD
    flops = 2 * B_PAD * matmul_terms
    bytes_accessed = (
        B_PAD * IN_PAD * 4 + B_PAD * T_PAD * 1 + B_PAD * T_PAD * 4   # inputs
        + matmul_terms * 2                                            # bf16 weights
        + (D + D + T_PAD + M + IN_PAD) * 4                            # f32 biases
        + B_PAD * T_PAD * 4 + B_PAD * 128 * 4 + B_PAD * IN_PAD * 4    # outputs
    )

    logits_p, idx_slab, newemb_p = pl.pallas_call(
        target_entity_head_kernel,
        grid=grid,
        in_specs=in_specs,
        out_specs=out_specs,
        out_shape=out_shape,
        compiler_params=pltpu.CompilerParams(
            dimension_semantics=("parallel",),
        ),
        cost_estimate=pl.CostEstimate(
            flops=flops, transcendentals=0, bytes_accessed=bytes_accessed),
    )(
        emb_p, mask_p, noise,
        w1, b1, w2, b2, w3, b3, we1, be1, we2, be2,
    )

    logits = logits_p[:B, :T]
    targetentity = idx_slab[:B, 0]
    new_emb = newemb_p[:B, :IN]
    return logits, targetentity, new_emb


def init_params(key, input_dim, decode_dim, targetentity_dim, targetentity_map_dim):
    ks = jax.random.split(key, 5)

    def lin(kw, fan_in, fan_out):
        s = 1.0 / jnp.sqrt(jnp.float32(fan_in))
        return jax.random.uniform(kw, (fan_in, fan_out), jnp.float32, -s, s)

    return {
        "w1": lin(ks[0], input_dim, decode_dim),
        "b1": jnp.zeros((1, decode_dim), jnp.float32),
        "w2": lin(ks[1], decode_dim, decode_dim),
        "b2": jnp.zeros((1, decode_dim), jnp.float32),
        "w3": lin(ks[2], decode_dim, targetentity_dim),
        "b3": jnp.zeros((1, targetentity_dim), jnp.float32),
        "we1": lin(ks[3], targetentity_dim, targetentity_map_dim),
        "be1": jnp.zeros((1, targetentity_map_dim), jnp.float32),
        "we2": lin(ks[4], targetentity_map_dim, input_dim),
        "be2": jnp.zeros((1, input_dim), jnp.float32),
    }


if __name__ == "__main__":
    B = 8
    INPUT_DIM = 32
    DECODE_DIM = 32
    TARGETENTITY_DIM = 16
    TARGETENTITY_MAP_DIM = 16

    key = jax.random.PRNGKey(0)
    k_emb, k_feat, k_mask, k_par, k_sample = jax.random.split(key, 5)

    params = init_params(
        k_par, INPUT_DIM, DECODE_DIM, TARGETENTITY_DIM, TARGETENTITY_MAP_DIM)

    embedding = jax.random.normal(k_emb, (B, INPUT_DIM), jnp.float32)
    additional_feature = jax.random.normal(k_feat, (B, INPUT_DIM), jnp.float32)
    mask = jax.random.bernoulli(k_mask, 0.7, (B, TARGETENTITY_DIM))
    mask = mask.at[:, 0].set(True)  # keep at least one valid entity per row

    logits, targetentity, new_emb = target_entity_head(
        params, embedding, additional_feature, mask, k_sample)
    jax.block_until_ready((logits, targetentity, new_emb))

    assert logits.shape == (B, TARGETENTITY_DIM)
    assert targetentity.shape == (B,)
    assert new_emb.shape == (B, INPUT_DIM)
    # sampled indices must always land on unmasked entities
    assert bool(jnp.all(mask[jnp.arange(B), targetentity]))

    print("KERNEL_OK")
</pallas_src>

<mosaic_0001>
module attributes {stable_mosaic.version = 11 : i64} {
  func.func @target_entity_head_kernel(%arg0: i32, %arg1: memref<8x128xf32, #tpu.memory_space<vmem>>, %arg2: memref<8x128xi8, #tpu.memory_space<vmem>>, %arg3: memref<8x128xf32, #tpu.memory_space<vmem>>, %arg4: memref<128x32xbf16, #tpu.memory_space<vmem>>, %arg5: memref<1x32xf32, #tpu.memory_space<vmem>>, %arg6: memref<32x32xbf16, #tpu.memory_space<vmem>>, %arg7: memref<1x32xf32, #tpu.memory_space<vmem>>, %arg8: memref<32x128xbf16, #tpu.memory_space<vmem>>, %arg9: memref<1x128xf32, #tpu.memory_space<vmem>>, %arg10: memref<128x16xbf16, #tpu.memory_space<vmem>>, %arg11: memref<1x16xf32, #tpu.memory_space<vmem>>, %arg12: memref<16x128xbf16, #tpu.memory_space<vmem>>, %arg13: memref<1x128xf32, #tpu.memory_space<vmem>>, %arg14: memref<8x128xf32, #tpu.memory_space<vmem>>, %arg15: memref<8x128xi32, #tpu.memory_space<vmem>>, %arg16: memref<8x128xf32, #tpu.memory_space<vmem>>) attributes {dimension_semantics = [#tpu.dimension_semantics<parallel>], iteration_bounds = array<i64: 1>, scalar_prefetch = 0 : i64, scratch_operands = 0 : i64, tpu.core_type = #tpu.core_type<tc>, window_params = [{transform_indices = @transform_0, window_bounds = array<i64: 8, 128>}, {transform_indices = @transform_1, window_bounds = array<i64: 8, 128>}, {transform_indices = @transform_2, window_bounds = array<i64: 8, 128>}, {pipeline_mode = #tpu.pipeline_mode<synchronous>, transform_indices = @transform_3, window_bounds = array<i64: 128, 32>}, {pipeline_mode = #tpu.pipeline_mode<synchronous>, transform_indices = @transform_4, window_bounds = array<i64: 1, 32>}, {pipeline_mode = #tpu.pipeline_mode<synchronous>, transform_indices = @transform_5, window_bounds = array<i64: 32, 32>}, {pipeline_mode = #tpu.pipeline_mode<synchronous>, transform_indices = @transform_6, window_bounds = array<i64: 1, 32>}, {pipeline_mode = #tpu.pipeline_mode<synchronous>, transform_indices = @transform_7, window_bounds = array<i64: 32, 128>}, {pipeline_mode = #tpu.pipeline_mode<synchronous>, transform_indices = @transform_8, window_bounds = array<i64: 1, 128>}, {pipeline_mode = #tpu.pipeline_mode<synchronous>, transform_indices = @transform_9, window_bounds = array<i64: 128, 16>}, {pipeline_mode = #tpu.pipeline_mode<synchronous>, transform_indices = @transform_10, window_bounds = array<i64: 1, 16>}, {pipeline_mode = #tpu.pipeline_mode<synchronous>, transform_indices = @transform_11, window_bounds = array<i64: 16, 128>}, {pipeline_mode = #tpu.pipeline_mode<synchronous>, transform_indices = @transform_12, window_bounds = array<i64: 1, 128>}, {transform_indices = @transform_13, window_bounds = array<i64: 8, 128>}, {transform_indices = @transform_14, window_bounds = array<i64: 8, 128>}, {transform_indices = @transform_15, window_bounds = array<i64: 8, 128>}]} {
    %c0 = arith.constant 0 : index
    %c0_0 = arith.constant 0 : index
    %0 = vector.load %arg1[%c0, %c0_0] : memref<8x128xf32, #tpu.memory_space<vmem>>, vector<8x128xf32>
    %1 = arith.truncf %0 : vector<8x128xf32> to vector<8x128xbf16>
    %c0_1 = arith.constant 0 : index
    %c0_2 = arith.constant 0 : index
    %2 = vector.load %arg4[%c0_1, %c0_2] : memref<128x32xbf16, #tpu.memory_space<vmem>>, vector<128x32xbf16>
    %cst = arith.constant dense<0.000000e+00> : vector<8x32xf32>
    %3 = tpu.matmul %1, %2, %cst {dimension_numbers = #tpu.dot_dimension_numbers<[1], [0], [0], [1], [0, 0, 1, 1], [], []>} : vector<8x128xbf16>, vector<128x32xbf16>, vector<8x32xf32> -> vector<8x32xf32>
    %c0_3 = arith.constant 0 : index
    %c0_4 = arith.constant 0 : index
    %4 = vector.load %arg5[%c0_3, %c0_4] : memref<1x32xf32, #tpu.memory_space<vmem>>, vector<1x32xf32>
    %5 = vector.broadcast %4 : vector<1x32xf32> to vector<8x32xf32>
    %6 = arith.addf %3, %5 : vector<8x32xf32>
    %cst_5 = arith.constant 0.000000e+00 : f32
    %7 = vector.broadcast %cst_5 : f32 to vector<8x32xf32>
    %8 = arith.maximumf %6, %7 : vector<8x32xf32>
    %9 = arith.truncf %8 : vector<8x32xf32> to vector<8x32xbf16>
    %c0_6 = arith.constant 0 : index
    %c0_7 = arith.constant 0 : index
    %10 = vector.load %arg6[%c0_6, %c0_7] : memref<32x32xbf16, #tpu.memory_space<vmem>>, vector<32x32xbf16>
    %cst_8 = arith.constant dense<0.000000e+00> : vector<8x32xf32>
    %11 = tpu.matmul %9, %10, %cst_8 {dimension_numbers = #tpu.dot_dimension_numbers<[1], [0], [0], [1], [0, 0, 1, 1], [], []>} : vector<8x32xbf16>, vector<32x32xbf16>, vector<8x32xf32> -> vector<8x32xf32>
    %c0_9 = arith.constant 0 : index
    %c0_10 = arith.constant 0 : index
    %12 = vector.load %arg7[%c0_9, %c0_10] : memref<1x32xf32, #tpu.memory_space<vmem>>, vector<1x32xf32>
    %13 = vector.broadcast %12 : vector<1x32xf32> to vector<8x32xf32>
    %14 = arith.addf %11, %13 : vector<8x32xf32>
    %cst_11 = arith.constant 0.000000e+00 : f32
    %15 = vector.broadcast %cst_11 : f32 to vector<8x32xf32>
    %16 = arith.maximumf %14, %15 : vector<8x32xf32>
    %17 = arith.truncf %16 : vector<8x32xf32> to vector<8x32xbf16>
    %c0_12 = arith.constant 0 : index
    %c0_13 = arith.constant 0 : index
    %18 = vector.load %arg8[%c0_12, %c0_13] : memref<32x128xbf16, #tpu.memory_space<vmem>>, vector<32x128xbf16>
    %cst_14 = arith.constant dense<0.000000e+00> : vector<8x128xf32>
    %19 = tpu.matmul %17, %18, %cst_14 {dimension_numbers = #tpu.dot_dimension_numbers<[1], [0], [0], [1], [0, 0, 1, 1], [], []>} : vector<8x32xbf16>, vector<32x128xbf16>, vector<8x128xf32> -> vector<8x128xf32>
    %c0_15 = arith.constant 0 : index
    %c0_16 = arith.constant 0 : index
    %20 = vector.load %arg9[%c0_15, %c0_16] : memref<1x128xf32, #tpu.memory_space<vmem>>, vector<1x128xf32>
    %21 = vector.broadcast %20 : vector<1x128xf32> to vector<8x128xf32>
    %22 = arith.addf %19, %21 : vector<8x128xf32>
    %c0_17 = arith.constant 0 : index
    %c0_18 = arith.constant 0 : index
    %23 = vector.load %arg2[%c0_17, %c0_18] : memref<8x128xi8, #tpu.memory_space<vmem>>, vector<8x128xi8>
    %c0_i8 = arith.constant 0 : i8
    %24 = vector.broadcast %c0_i8 : i8 to vector<8x128xi8>
    %25 = arith.cmpi ne, %23, %24 : vector<8x128xi8>
    %cst_19 = arith.constant -1.000000e+09 : f32
    %26 = vector.broadcast %cst_19 : f32 to vector<8x128xf32>
    %27 = arith.select %25, %22, %26 : vector<8x128xi1>, vector<8x128xf32>
    %c0_20 = arith.constant 0 : index
    %c0_21 = arith.constant 0 : index
    %28 = vector.load %arg14[%c0_20, %c0_21] : memref<8x128xf32, #tpu.memory_space<vmem>>, vector<8x128xf32>
    tpu.vector_store %arg14[%c0_20, %c0_21], %27 {strides = array<i32>} : memref<8x128xf32, #tpu.memory_space<vmem>>, vector<8x128xf32>,
    %c0_22 = arith.constant 0 : index
    %c0_23 = arith.constant 0 : index
    %29 = vector.load %arg3[%c0_22, %c0_23] : memref<8x128xf32, #tpu.memory_space<vmem>>, vector<8x128xf32>
    %30 = arith.addf %27, %29 : vector<8x128xf32>
    %31 = tpu.iota {dimensions = array<i32: 1>} : vector<8x128xi32>
    %cst_24 = arith.constant dense<0xFF800000> : vector<8xf32>
    %32 = vector.multi_reduction <maximumf>, %30, %cst_24 [1] : vector<8x128xf32> to vector<8xf32>
    %33 = vector.shape_cast %32 : vector<8xf32> to vector<8x1xf32>
    %34 = vector.broadcast %33 : vector<8x1xf32> to vector<8x128xf32>
    %35 = arith.cmpf oeq, %30, %34 : vector<8x128xf32>
    %c128_i32 = arith.constant 128 : i32
    %36 = vector.broadcast %c128_i32 : i32 to vector<8x128xi32>
    %37 = arith.select %35, %31, %36 : vector<8x128xi1>, vector<8x128xi32>
    %cst_25 = arith.constant dense<2147483647> : vector<8xi32>
    %38 = vector.multi_reduction <minsi>, %37, %cst_25 [1] : vector<8x128xi32> to vector<8xi32>
    %39 = vector.shape_cast %38 : vector<8xi32> to vector<8x1xi32>
    %40 = vector.shape_cast %39 : vector<8x1xi32> to vector<8x1xi32>
    %41 = vector.broadcast %40 : vector<8x1xi32> to vector<8x128xi32>
    %c0_26 = arith.constant 0 : index
    %c0_27 = arith.constant 0 : index
    %42 = vector.load %arg15[%c0_26, %c0_27] : memref<8x128xi32, #tpu.memory_space<vmem>>, vector<8x128xi32>
    tpu.vector_store %arg15[%c0_26, %c0_27], %41 {strides = array<i32>} : memref<8x128xi32, #tpu.memory_space<vmem>>, vector<8x128xi32>,
    %43 = vector.broadcast %39 : vector<8x1xi32> to vector<8x128xi32>
    %44 = arith.cmpi eq, %31, %43 : vector<8x128xi32>
    %45 = arith.extui %44 : vector<8x128xi1> to vector<8x128xi32>
    %46 = arith.sitofp %45 : vector<8x128xi32> to vector<8x128xf32>
    %47 = arith.truncf %46 : vector<8x128xf32> to vector<8x128xbf16>
    %c0_28 = arith.constant 0 : index
    %c0_29 = arith.constant 0 : index
    %48 = vector.load %arg10[%c0_28, %c0_29] : memref<128x16xbf16, #tpu.memory_space<vmem>>, vector<128x16xbf16>
    %cst_30 = arith.constant dense<0.000000e+00> : vector<8x16xf32>
    %49 = tpu.matmul %47, %48, %cst_30 {dimension_numbers = #tpu.dot_dimension_numbers<[1], [0], [0], [1], [0, 0, 1, 1], [], []>} : vector<8x128xbf16>, vector<128x16xbf16>, vector<8x16xf32> -> vector<8x16xf32>
    %c0_31 = arith.constant 0 : index
    %c0_32 = arith.constant 0 : index
    %50 = vector.load %arg11[%c0_31, %c0_32] : memref<1x16xf32, #tpu.memory_space<vmem>>, vector<1x16xf32>
    %51 = vector.broadcast %50 : vector<1x16xf32> to vector<8x16xf32>
    %52 = arith.addf %49, %51 : vector<8x16xf32>
    %cst_33 = arith.constant 0.000000e+00 : f32
    %53 = vector.broadcast %cst_33 : f32 to vector<8x16xf32>
    %54 = arith.maximumf %52, %53 : vector<8x16xf32>
    %55 = arith.truncf %54 : vector<8x16xf32> to vector<8x16xbf16>
    %c0_34 = arith.constant 0 : index
    %c0_35 = arith.constant 0 : index
    %56 = vector.load %arg12[%c0_34, %c0_35] : memref<16x128xbf16, #tpu.memory_space<vmem>>, vector<16x128xbf16>
    %cst_36 = arith.constant dense<0.000000e+00> : vector<8x128xf32>
    %57 = tpu.matmul %55, %56, %cst_36 {dimension_numbers = #tpu.dot_dimension_numbers<[1], [0], [0], [1], [0, 0, 1, 1], [], []>} : vector<8x16xbf16>, vector<16x128xbf16>, vector<8x128xf32> -> vector<8x128xf32>
    %c0_37 = arith.constant 0 : index
    %c0_38 = arith.constant 0 : index
    %58 = vector.load %arg13[%c0_37, %c0_38] : memref<1x128xf32, #tpu.memory_space<vmem>>, vector<1x128xf32>
    %59 = vector.broadcast %58 : vector<1x128xf32> to vector<8x128xf32>
    %60 = arith.addf %57, %59 : vector<8x128xf32>
    %61 = arith.addf %0, %60 : vector<8x128xf32>
    %c0_39 = arith.constant 0 : index
    %c0_40 = arith.constant 0 : index
    %62 = vector.load %arg16[%c0_39, %c0_40] : memref<8x128xf32, #tpu.memory_space<vmem>>, vector<8x128xf32>
    tpu.vector_store %arg16[%c0_39, %c0_40], %61 {strides = array<i32>} : memref<8x128xf32, #tpu.memory_space<vmem>>, vector<8x128xf32>,
    return
  }
  func.func @transform_0(%arg0: i32) -> (i32, i32) {
    %c0_i32 = arith.constant 0 : i32
    %c0_i32_0 = arith.constant 0 : i32
    return %arg0, %c0_i32 : i32, i32
  }
  func.func @transform_1(%arg0: i32) -> (i32, i32) {
    %c0_i32 = arith.constant 0 : i32
    %c0_i32_0 = arith.constant 0 : i32
    return %arg0, %c0_i32 : i32, i32
  }
  func.func @transform_2(%arg0: i32) -> (i32, i32) {
    %c0_i32 = arith.constant 0 : i32
    %c0_i32_0 = arith.constant 0 : i32
    return %arg0, %c0_i32 : i32, i32
  }
  func.func @transform_3(%arg0: i32) -> (i32, i32) {
    %c0_i32 = arith.constant 0 : i32
    %c0_i32_0 = arith.constant 0 : i32
    %c0_i32_1 = arith.constant 0 : i32
    return %c0_i32, %c0_i32_0 : i32, i32
  }
  func.func @transform_4(%arg0: i32) -> (i32, i32) {
    %c0_i32 = arith.constant 0 : i32
    %c0_i32_0 = arith.constant 0 : i32
    %c0_i32_1 = arith.constant 0 : i32
    return %c0_i32, %c0_i32_0 : i32, i32
  }
  func.func @transform_5(%arg0: i32) -> (i32, i32) {
    %c0_i32 = arith.constant 0 : i32
    %c0_i32_0 = arith.constant 0 : i32
    %c0_i32_1 = arith.constant 0 : i32
    return %c0_i32, %c0_i32_0 : i32, i32
  }
  func.func @transform_6(%arg0: i32) -> (i32, i32) {
    %c0_i32 = arith.constant 0 : i32
    %c0_i32_0 = arith.constant 0 : i32
    %c0_i32_1 = arith.constant 0 : i32
    return %c0_i32, %c0_i32_0 : i32, i32
  }
  func.func @transform_7(%arg0: i32) -> (i32, i32) {
    %c0_i32 = arith.constant 0 : i32
    %c0_i32_0 = arith.constant 0 : i32
    %c0_i32_1 = arith.constant 0 : i32
    return %c0_i32, %c0_i32_0 : i32, i32
  }
  func.func @transform_8(%arg0: i32) -> (i32, i32) {
    %c0_i32 = arith.constant 0 : i32
    %c0_i32_0 = arith.constant 0 : i32
    %c0_i32_1 = arith.constant 0 : i32
    return %c0_i32, %c0_i32_0 : i32, i32
  }
  func.func @transform_9(%arg0: i32) -> (i32, i32) {
    %c0_i32 = arith.constant 0 : i32
    %c0_i32_0 = arith.constant 0 : i32
    %c0_i32_1 = arith.constant 0 : i32
    return %c0_i32, %c0_i32_0 : i32, i32
  }
  func.func @transform_10(%arg0: i32) -> (i32, i32) {
    %c0_i32 = arith.constant 0 : i32
    %c0_i32_0 = arith.constant 0 : i32
    %c0_i32_1 = arith.constant 0 : i32
    return %c0_i32, %c0_i32_0 : i32, i32
  }
  func.func @transform_11(%arg0: i32) -> (i32, i32) {
    %c0_i32 = arith.constant 0 : i32
    %c0_i32_0 = arith.constant 0 : i32
    %c0_i32_1 = arith.constant 0 : i32
    return %c0_i32, %c0_i32_0 : i32, i32
  }
  func.func @transform_12(%arg0: i32) -> (i32, i32) {
    %c0_i32 = arith.constant 0 : i32
    %c0_i32_0 = arith.constant 0 : i32
    %c0_i32_1 = arith.constant 0 : i32
    return %c0_i32, %c0_i32_0 : i32, i32
  }
  func.func @transform_13(%arg0: i32) -> (i32, i32) {
    %c0_i32 = arith.constant 0 : i32
    %c0_i32_0 = arith.constant 0 : i32
    return %arg0, %c0_i32 : i32, i32
  }
  func.func @transform_14(%arg0: i32) -> (i32, i32) {
    %c0_i32 = arith.constant 0 : i32
    %c0_i32_0 = arith.constant 0 : i32
    return %arg0, %c0_i32 : i32, i32
  }
  func.func @transform_15(%arg0: i32) -> (i32, i32) {
    %c0_i32 = arith.constant 0 : i32
    %c0_i32_0 = arith.constant 0 : i32
    return %arg0, %c0_i32 : i32, i32
  }
}

</mosaic_0001>

<bundles_post_ra>
// kernel: target_entity_head.1
= control target key start
LH: loop header
LB: loop body
LE: loop exit
PB: predicated region body
PF: predicated region fallthrough
CT: control target
= control target key end

     0   :  { %21 = vsyncpa [#allocation3], 0  ;;  %s753_s0 = inlined_call_operand.vmem [shape: f32[8,128], index: 0, kind: input, shape index: {}]   ;;  %s754_s1 = inlined_call_operand.vmem [shape: s8[8,128], index: 1, kind: input, shape index: {}]   ;;  %s755_s2 = inlined_call_operand.vmem [shape: f32[8,128], index: 2, kind: input, shape index: {}]   ;;  %s756_s3 = inlined_call_operand.vmem [shape: bf16[128,32], index: 3, kind: input, shape index: {}]   ;;  %s757_s4 = inlined_call_operand.vmem [shape: f32[1,32], index: 4, kind: input, shape index: {}]   ;;  %s758_s5 = inlined_call_operand.vmem [shape: bf16[32,32], index: 5, kind: input, shape index: {}]   ;;  %s759_s6 = inlined_call_operand.vmem [shape: f32[1,32], index: 6, kind: input, shape index: {}]   ;;  %s760_s7 = inlined_call_operand.vmem [shape: bf16[32,128], index: 7, kind: input, shape index: {}]   ;;  %s761_s8 = inlined_call_operand.vmem [shape: f32[1,128], index: 8, kind: input, shape index: {}]   ;;  %s762_s9 = inlined_call_operand.vmem [shape: bf16[128,16], index: 9, kind: input, shape index: {}]   ;;  %s763_s10 = inlined_call_operand.vmem [shape: f32[1,16], index: 10, kind: input, shape index: {}]   ;;  %s764_s11 = inlined_call_operand.vmem [shape: bf16[16,128], index: 11, kind: input, shape index: {}]   ;;  %s765_s12 = inlined_call_operand.vmem [shape: f32[1,128], index: 12, kind: input, shape index: {}]   ;;  %s766_s13 = inlined_call_operand.hbm [shape: f32[8,128], index: 13, kind: output, shape index: {0}]   ;;  %s767_s14 = inlined_call_operand.vmem [shape: s32[8,128], index: 14, kind: output, shape index: {1}]   ;;  %s768_s15 = inlined_call_operand.hbm [shape: f32[8,128], index: 15, kind: output, shape index: {2}]  }
   0x1   :  { %v493_v0 = vld [vmem:[%s756_s3 + $0x38] sm:$0xff]  ;;  %v492_v1 = vld [vmem:[%s756_s3 + $0x30] sm:$0xff] }
   0x2   :  { %122 = vmatpush.bf16.msra.mxu0 %v493_v0 }
   0x3   :  { %22 = vsyncpa [#allocation5], 0  ;;  %v491_v2 = vld [vmem:[%s756_s3 + $0x28] sm:$0xff]  ;;  %v490_v3 = vld [vmem:[%s756_s3 + $0x20] sm:$0xff]  ;;  %vm157_vm0 = vcmask 261120   ;;  %v568_v27 = vmov 0   ;;  %v221_v37 = vlaneseq }
   0x4   :  { %v489_v4 = vld [vmem:[%s756_s3 + $0x18] sm:$0xff]  ;;  %v488_v5 = vld [vmem:[%s756_s3 + $0x10] sm:$0xff]  ;;  %v487_v6 = vld [vmem:[%s756_s3 + $0x8] sm:$0xff]  ;;  %v569_v61 = vmov 1.0|1.0   ;;  %vm341_vm7 = vcmask 130048  }
   0x5   :  { %v486_v7 = vld [vmem:[%s756_s3] sm:$0xff]  ;;  %v495_v10 = vld [vmem:[%s758_s5 + $0x8] sm:$0xff]  ;;  %v222_v38 = vand.u32 127, %v221_v37  ;;  %v505_v43 = vld [vmem:[%s762_s9 + $0x38] sm:$0xff]  ;;  %s380_s20 = sshll.u32 %s768_s15, 4  ;;  %s381_s20 = int_to_ptr.hbm [resolvable:$true] %s380_s20 }
   0x6   :  { %123 = vmatpush.bf16.msra.mxu0 %v492_v1  ;;  %v679_v8 = vld [vmem:[%s753_s0] sm:$0xff]  ;;  %167 = vmatpush.bf16.msra.mxu1 %v495_v10  ;;  %v497_v18 = vld [vmem:[%s760_s7 + $0x8] sm:$0xff]  ;;  %v504_v44 = vld [vmem:[%s762_s9 + $0x30] sm:$0xff] }
   0x7   :  { %v53_v9 = vpack.c.bf16 %v679_v8, %v679_v8  ;;  %v494_v11 = vld [vmem:[%s758_s5] sm:$0xff]  ;;  %205 = vmatpush.bf16.msra.mxu2 %v497_v18  ;;  %314 = vmatpush.bf16.msra.mxu3 %v505_v43  ;;  %v503_v45 = vld [vmem:[%s762_s9 + $0x28] sm:$0xff]  ;;  %v501_v47 = vld [vmem:[%s762_s9 + $0x18] sm:$0xff] }
   0x8   :  { %v511_v12 = vld [vmem:[%s757_s4] ss:$0 sm:$0xff]  ;;  %v500_v48 = vld [vmem:[%s762_s9 + $0x10] sm:$0xff]  ;;  %v499_v49 = vld [vmem:[%s762_s9 + $0x8] sm:$0xff] }
   0x9   :  { %v496_v19 = vld [vmem:[%s760_s7] sm:$0xff] }
   0xa   :  { %124 = vmatpush.bf16.msra.mxu0 %v491_v2  ;;  %168 = vmatpush.bf16.msra.mxu1 %v494_v11  ;;  %v512_v20 = vld [vmem:[%s759_s6] ss:$0 sm:$0xff] }
   0xb   :  { %206 = vmatpush.bf16.msra.mxu2 %v496_v19  ;;  %v212_v26 = vld [vmem:[%s754_s1] sm:$0x3]  ;;  %315 = vmatpush.bf16.msra.mxu3 %v504_v44 }
   0xc   :  { %vm213_vm1 = vnez %v212_v26  ;;  %v513_v30 = vld [vmem:[%s761_s8] ss:$0 sm:$0xff] }
   0xd   :  { %v214_v28 = vsel %vm213_vm1, 16843009, %v568_v27  ;;  %v219_v33 = vld [vmem:[%s755_s2] sm:$0xff] }
   0xe   :  { %125 = vmatpush.bf16.msra.mxu0 %v490_v3  ;;  %v215_v29 = vunpack.c.0.s8 %v214_v28  ;;  %v502_v46 = vld [vmem:[%s762_s9 + $0x20] sm:$0xff] }
   0xf   :  { %316 = vmatpush.bf16.msra.mxu3 %v503_v45  ;;  %v498_v54 = vld [vmem:[%s762_s9] sm:$0xff] }
  0x10   :  { %vm216_vm2 = vcmp.ne.s32.totalorder %v215_v29, 0  ;;  %v506_v55 = vld [vmem:[%s764_s11] sm:$0xff]  ;;  %s570_s11 = smov [#allocation2]  }
  0x11   :  { %352 = vmatpush.bf16.msrb.mxu1 %v506_v55  ;;  %v514_v62 = vld [vmem:[%s763_s10] ss:$0 sm:$0xff]  ;;  %s365_s16 = sshll.u32 %s570_s11, 4  ;;  %s571_s10 = smov [#allocation4]   ;;  %s366_s16 = int_to_ptr.vmem [resolvable:$true] %s365_s16 }
  0x12   :  { %126 = vmatpush.bf16.msra.mxu0 %v489_v4  ;;  %v515_v4 = vld [vmem:[%s765_s12] ss:$0 sm:$0xff]  ;;  %s378_s18 = sshll.u32 %s571_s10, 4  ;;  %s379_s18 = int_to_ptr.vmem [resolvable:$true] %s378_s18 }
  0x13   :  { %317 = vmatpush.bf16.msra.mxu3 %v502_v46 }
  0x16   :  { %127 = vmatpush.bf16.msra.mxu0 %v488_v5 }
  0x17   :  { %318 = vmatpush.bf16.msra.mxu3 %v501_v47 }
  0x1a   :  { %128 = vmatpush.bf16.msra.mxu0 %v487_v6 }
  0x1b   :  { %319 = vmatpush.bf16.msra.mxu3 %v500_v48 }
  0x1e   :  { %129 = vmatpush.bf16.msra.mxu0 %v486_v7 }
  0x1f   :  { %320 = vmatpush.bf16.msra.mxu3 %v499_v49 }
  0x21   :  { %130 = vmatmul.bf16.vlgmr.msra.gmra.mxu0 %v53_v9 }
  0x23   :  { %321 = vmatpush.bf16.msra.mxu3 %v498_v54 }
  0x9e   :  { %v131_v13 = vpop.f32.mrf.mxu0 }
  0x9f   :  { %v132_v14 = vadd.f32 %v511_v12, %v131_v13 }
  0xa1   :  { %v135_v15 = vmax.f32 %v132_v14, 0.0 }
  0xa3   :  { %v136_v16 = vpack.c.bf16 %v135_v15, %v135_v15 }
  0xa5   :  { %436 = vmatmul.msk.bf16.vlgmr.msra.gmra.mxu1 %vm157_vm0, %v136_v16 }
  0xa6   :  { %v133_v17 = vpop.f32.mrf.mxu0 }
 0x122   :  { %v170_v21 = vpop.f32.mrf.mxu1 }
 0x123   :  { %v171_v22 = vadd.f32 %v512_v20, %v170_v21 }
 0x125   :  { %v174_v23 = vmax.f32 %v171_v22, 0.0 }
 0x127   :  { %v175_v24 = vpack.c.bf16 %v174_v23, %v174_v23 }
 0x129   :  { %445 = vmatmul.msk.bf16.vlgmr.msra.gmra.mxu2 %vm157_vm0, %v175_v24 }
 0x12a   :  { %v172_v25 = vpop.f32.mrf.mxu1 }
 0x1ac   :  { %v208_v31 = vpop.f32.mrf.mxu2 }
 0x1ad   :  { %v209_v32 = vadd.f32 %v513_v30, %v208_v31 }
 0x1af   :  { %v217_v34 = vsel %vm216_vm2, %v209_v32, -1e+09 }
 0x1b0   :  { %v220_v35 = vadd.f32 %v219_v33, %v217_v34  ;;  %218 = vst [vmem:[#allocation2] sm:$0xff] %v217_v34 }
 0x1b2   :  { %223 = vmax.xlane.f32.xlu0 %v220_v35 }
 0x1b4   :  { %v210_v36 = vpop.f32.mrf.mxu2 }
 0x225   :  { %v224_v39 = vpop.xlane.xlu0 %223 }
 0x226   :  { %vm225_vm3 = vcmp.eq.f32.partialorder %v220_v35, %v224_v39 }
 0x227   :  { %v226_v40 = vsel %vm225_vm3, %v222_v38, 128 }
 0x228   :  { %v228_v41 = vshra.s32 %v226_v40, 16  ;;  %v227_v50 = vand.u32 65535, %v226_v40 }
 0x22a   :  { %v230_v42 = vcvt.s32.f32 %v228_v41  ;;  %v229_v52 = vcvt.s32.f32 %v227_v50 }
 0x22c   :  { %231 = vmin.xlane.f32.xlu0 %v230_v42 }
 0x29f   :  { %v232_v51 = vpop.xlane.xlu0 %231 }
 0x2a0   :  { %vm233_vm4 = vcmp.eq.f32.partialorder %v230_v42, %v232_v51  ;;  %v238_v56 = vcvt.f32.s32 %v232_v51 }
 0x2a1   :  { %v234_v53 = vsel %vm233_vm4, %v229_v52, inf }
 0x2a2   :  { %235 = vmin.xlane.f32.xlu1 %v234_v53  ;;  %v239_v58 = vshll.u32 %v238_v56, 16 }
 0x315   :  { %v236_v57 = vpop.xlane.xlu1 %235 }
 0x316   :  { %v237_v59 = vcvt.f32.s32 %v236_v57 }
 0x318   :  { %v240_v60 = vadd.s32 %v239_v58, %v237_v59 }
 0x31a   :  { %241 = vst [vmem:[%s767_s14] sm:$0xff] %v240_v60  ;;  %vm242_vm5 = vcmp.eq.s32.totalorder %v222_v38, %v240_v60  ;;  %s367_s14 = sshll.u32 %s766_s13, 4  ;;  %s368_s14 = int_to_ptr.hbm [resolvable:$true] %s367_s14 }
 0x31b   :  { %vm479_vm6 = vmpackc.low %vm242_vm5, %vm242_vm5  ;;  %370 = dma.vmem_to_hbm [thread:$0]  %s366_s16, 128, %s368_s14, [#allocation3]  }
 0x31c   :  { %480 = vmatmul.msk.bf16.vlgmr.msra.gmra.mxu3 %vm479_vm6, %v569_v61 }
 0x39f   :  { %v323_v63 = vpop.f32.mrf.mxu3 }
 0x3a0   :  { %v324_v0 = vadd.f32 %v514_v62, %v323_v63 }
 0x3a2   :  { %v327_v1 = vmax.f32 %v324_v0, 0.0 }
 0x3a4   :  { %v328_v2 = vpack.c.bf16 %v327_v1, %v327_v1 }
 0x3a6   :  { %485 = vmatmul.msk.bf16.vlgmr.msrb.gmra.mxu1 %vm341_vm7, %v328_v2 }
 0x3a7   :  { %v325_v3 = vpop.f32.mrf.mxu3 }
 0x423   :  { %v354_v5 = vpop.f32.mrf.mxu1 }
 0x424   :  { %v355_v6 = vadd.f32 %v515_v4, %v354_v5 }
 0x426   :  { %v358_v7 = vadd.f32 %v355_v6, %v679_v8 }
 0x428   :  { %359 = vst [vmem:[#allocation4] sm:$0xff] %v358_v7 }
 0x429   :  { %383 = dma.vmem_to_hbm [thread:$0]  %s379_s18, 128, %s381_s20, [#allocation5]  }
 0x42b   :  { %v356_v9 = vpop.f32.mrf.mxu1 }
 0x42c   :  { %564 = dma.done.wait [#allocation3], 128  }
 0x42d   :  { %565 = vsyncadd [#allocation3], 4294967168 }
 0x42e   :  { %566 = dma.done.wait [#allocation5], 128  }
 0x42f   :  { %567 = vsyncadd [#allocation5], 4294967168 }
 0x430   :  { %394 = vsyncpa [#allocation3], 1 }
 0x431   :  { %395 = vsyncpa [#allocation5], 1 }

</bundles_post_ra>
